<compile_context>
chip_gen: v6e
topology: v6e:2x2x1
jax: 0.10.0
libtpu: 0.0.40
codegen_flags: <defaults>
</compile_context>

<pallas_src>
import functools

import jax
import jax.numpy as jnp
from jax.experimental import pallas as pl
from jax.experimental.pallas import tpu as pltpu


_SUBLANE = 16  # bf16 sublane packing; also satisfies the f32 (8, 128) rule.


def _round_up(x, m):
    return ((x + m - 1) // m) * m


def _choose_row_tile(M, tm_target, align=_SUBLANE):
    """Pick the row tile.  Prefer an aligned divisor of M so M_pad == M."""
    tm_target = max(align, min(_round_up(tm_target, align), _round_up(M, align)))
    if M % align == 0:
        for cand in range(tm_target, align - 1, -align):
            if M % cand == 0:
                if cand * 8 >= tm_target:
                    # Exact tiling: no padded rows, no trailing slice copy.
                    return cand, M
                # Largest aligned divisor is tiny -> per-step overhead would
                # dominate; fall back to padding M instead.
                break
    return tm_target, _round_up(M, tm_target)


def _patch_embed_kernel(x_ref, w_ref, b_ref, o_ref):
    # x_ref: (tm, K)  compute-dtype activation tile
    # w_ref: (K, N)   compute-dtype weight (grid-invariant -> VMEM resident)
    # b_ref: (1, N)   f32 bias            (grid-invariant -> VMEM resident)
    # o_ref: (tm, N)  output tile
    acc = jnp.dot(x_ref[...], w_ref[...], preferred_element_type=jnp.float32)
    o_ref[...] = (acc + b_ref[...]).astype(o_ref.dtype)


def patch_embed_matmul(patches, weight_t, bias, *, tm=8192,
                       compute_dtype=jnp.bfloat16, out_dtype=jnp.float32,
                       x_buffers=2):
    """(M, K) @ (K, N) + bias -> (M, N) on the MXU (f32 accumulation).

    patches:  (M, K) activations (cast to compute_dtype for the MXU)
    weight_t: (K, N) weight, transposed vs. the PyTorch nn.Linear layout
    bias:     (N,)
    """
    M, K = patches.shape
    Kw, N = weight_t.shape
    assert Kw == K

    tm_eff, M_pad = _choose_row_tile(M, tm)
    grid = M_pad // tm_eff

    x_p = patches.astype(compute_dtype)
    if M_pad != M:
        x_p = jnp.pad(x_p, ((0, M_pad - M), (0, 0)))     # zero rows: exact
    w_p = weight_t.astype(compute_dtype)
    b_p = bias.astype(jnp.float32).reshape(1, N)

    # Explicit scoped-VMEM budget: large row tiles overflow v5e's 16 MiB
    # default; cap at 64 MiB so the value is also valid on v7x (64 MiB / TC).
    x_bytes = jnp.dtype(compute_dtype).itemsize
    o_bytes = jnp.dtype(out_dtype).itemsize
    vmem_need = (max(2, x_buffers) * tm_eff * K * x_bytes
                 + 2 * tm_eff * N * o_bytes
                 + K * N * x_bytes + 4 * N)
    vmem_limit = int(min(max(2 * vmem_need, 32 << 20), 64 << 20))

    x_spec_kwargs = {}
    if x_buffers != 2:
        x_spec_kwargs["pipeline_mode"] = pl.Buffered(x_buffers)

    out = pl.pallas_call(
        _patch_embed_kernel,
        out_shape=jax.ShapeDtypeStruct((M_pad, N), out_dtype),
        grid_spec=pltpu.PrefetchScalarGridSpec(
            num_scalar_prefetch=0,
            grid=(grid,),
            in_specs=[
                pl.BlockSpec((tm_eff, K), lambda i: (i, 0), **x_spec_kwargs),
                pl.BlockSpec((K, N), lambda i: (0, 0)),
                pl.BlockSpec((1, N), lambda i: (0, 0)),
            ],
            out_specs=pl.BlockSpec((tm_eff, N), lambda i: (i, 0)),
        ),
        compiler_params=pltpu.CompilerParams(
            # "parallel" is free on v5e/v6e and shards the M axis across the
            # two TensorCores on v7x.
            dimension_semantics=("parallel",),
            vmem_limit_bytes=vmem_limit,
            # Let XLA fold the unfold transpose/reshape producer of `patches`
            # into the kernel's input DMA (avoids a full extra HBM pass).
            allow_input_fusion=[True, False, False],
        ),
    )(x_p, w_p, b_p)

    if M_pad != M:
        out = out[:M]        # only taken on pathological M; usually a no-op
    return out


def patch_embed_forward(x, weight, bias, patch_size, *, tm=8192,
                        compute_dtype=jnp.bfloat16, out_dtype=jnp.float32):
    """Equivalent of PatchEmbed.forward.

    x:      (b, c, h, w) NCHW (same as PyTorch)
    weight: (out_dim, c*p*p)  (PyTorch nn.Linear convention)
    bias:   (out_dim,)
    returns (b, h//p, w//p, out_dim) in out_dtype
    """
    b, c, h, w = x.shape
    p = patch_size
    hp, wp = h // p, w // p

    # nn.Unfold(p, stride=p): per-patch feature index = cc*(p*p) + ki*p + kj
    # (channel-major, then kernel row, then kernel col).  Cast first so the
    # relayout pass moves compute-dtype (bf16) bytes; the pallas_call's
    # allow_input_fusion lets XLA absorb this producer into the input DMA.
    patches = x.astype(compute_dtype).reshape(b, c, hp, p, wp, p)
    patches = patches.transpose(0, 2, 4, 1, 3, 5)        # (b, hp, wp, c, p, p)
    patches = patches.reshape(b * hp * wp, c * p * p)    # (M, K)

    out = patch_embed_matmul(patches, weight.T, bias, tm=tm,
                             compute_dtype=compute_dtype, out_dtype=out_dtype)
    return out.reshape(b, hp, wp, -1)


if __name__ == "__main__":
    # Small shapes consistent with the module: b=2, c=4, h=w=16, patch=4,
    # so in_features = 4*4*4 = 64, out_dim = 32, output (2, 4, 4, 32).
    patch_size = 4
    in_dim = 4
    out_dim = 32
    b, h, w = 2, 16, 16

    key = jax.random.PRNGKey(0)
    kx, kw, kb = jax.random.split(key, 3)

    x = jax.random.normal(kx, (b, in_dim, h, w), dtype=jnp.float32)

    # Deterministic nn.Linear-style init: uniform(-1/sqrt(K), 1/sqrt(K))
    K = in_dim * patch_size ** 2
    bound = 1.0 / (K ** 0.5)
    weight = jax.random.uniform(kw, (out_dim, K), dtype=jnp.float32,
                                minval=-bound, maxval=bound)
    bias = jax.random.uniform(kb, (out_dim,), dtype=jnp.float32,
                              minval=-bound, maxval=bound)

    fwd = jax.jit(functools.partial(patch_embed_forward, patch_size=patch_size))
    out = fwd(x, weight, bias)
    out = jax.block_until_ready(out)

    hp, wp = h // patch_size, w // patch_size
    ref_patches = x.reshape(b, in_dim, hp, patch_size, wp, patch_size)
    ref_patches = ref_patches.transpose(0, 2, 4, 1, 3, 5).reshape(-1, K)

    # Reference with the same bf16-MXU math as the kernel (tight tolerance).
    ref_bf16 = (jnp.dot(ref_patches.astype(jnp.bfloat16),
                        weight.T.astype(jnp.bfloat16),
                        preferred_element_type=jnp.float32)
                + bias).reshape(b, hp, wp, out_dim)
    # Pure-f32 module reference (loose tolerance for the bf16 input cast).
    ref_f32 = (ref_patches @ weight.T + bias).reshape(b, hp, wp, out_dim)

    assert out.shape == (b, hp, wp, out_dim)
    assert out.dtype == jnp.float32
    assert jnp.allclose(out, ref_bf16, atol=1e-3, rtol=1e-3)
    assert jnp.allclose(out, ref_f32, atol=3e-2, rtol=3e-2)

    print("KERNEL_OK")
</pallas_src>

<mosaic_0001>
module attributes {stable_mosaic.version = 11 : i64} {
  func.func @_patch_embed_kernel(%arg0: i32, %arg1: memref<32x64xbf16, #tpu.memory_space<vmem>>, %arg2: memref<64x32xbf16, #tpu.memory_space<vmem>>, %arg3: memref<1x32xf32, #tpu.memory_space<vmem>>, %arg4: memref<32x32xf32, #tpu.memory_space<vmem>>) attributes {dimension_semantics = [#tpu.dimension_semantics<parallel>], iteration_bounds = array<i64: 1>, scalar_prefetch = 0 : i64, scratch_operands = 0 : i64, tpu.core_type = #tpu.core_type<tc>, window_params = [{transform_indices = @transform_0, window_bounds = array<i64: 32, 64>}, {pipeline_mode = #tpu.pipeline_mode<synchronous>, transform_indices = @transform_1, window_bounds = array<i64: 64, 32>}, {pipeline_mode = #tpu.pipeline_mode<synchronous>, transform_indices = @transform_2, window_bounds = array<i64: 1, 32>}, {transform_indices = @transform_3, window_bounds = array<i64: 32, 32>}]} {
    %c0 = arith.constant 0 : index
    %c0_0 = arith.constant 0 : index
    %0 = vector.load %arg1[%c0, %c0_0] : memref<32x64xbf16, #tpu.memory_space<vmem>>, vector<32x64xbf16>
    %c0_1 = arith.constant 0 : index
    %c0_2 = arith.constant 0 : index
    %1 = vector.load %arg2[%c0_1, %c0_2] : memref<64x32xbf16, #tpu.memory_space<vmem>>, vector<64x32xbf16>
    %cst = arith.constant dense<0.000000e+00> : vector<32x32xf32>
    %2 = tpu.matmul %0, %1, %cst {dimension_numbers = #tpu.dot_dimension_numbers<[1], [0], [0], [1], [0, 0, 1, 1], [], []>} : vector<32x64xbf16>, vector<64x32xbf16>, vector<32x32xf32> -> vector<32x32xf32>
    %c0_3 = arith.constant 0 : index
    %c0_4 = arith.constant 0 : index
    %3 = vector.load %arg3[%c0_3, %c0_4] : memref<1x32xf32, #tpu.memory_space<vmem>>, vector<1x32xf32>
    %4 = vector.broadcast %3 : vector<1x32xf32> to vector<32x32xf32>
    %5 = arith.addf %2, %4 : vector<32x32xf32>
    %c0_5 = arith.constant 0 : index
    %c0_6 = arith.constant 0 : index
    %6 = vector.load %arg4[%c0_5, %c0_6] : memref<32x32xf32, #tpu.memory_space<vmem>>, vector<32x32xf32>
    tpu.vector_store %arg4[%c0_5, %c0_6], %5 {strides = array<i32>} : memref<32x32xf32, #tpu.memory_space<vmem>>, vector<32x32xf32>,
    return
  }
  func.func @transform_0(%arg0: i32) -> (i32, i32) {
    %c0_i32 = arith.constant 0 : i32
    %c0_i32_0 = arith.constant 0 : i32
    return %arg0, %c0_i32 : i32, i32
  }
  func.func @transform_1(%arg0: i32) -> (i32, i32) {
    %c0_i32 = arith.constant 0 : i32
    %c0_i32_0 = arith.constant 0 : i32
    %c0_i32_1 = arith.constant 0 : i32
    return %c0_i32, %c0_i32_0 : i32, i32
  }
  func.func @transform_2(%arg0: i32) -> (i32, i32) {
    %c0_i32 = arith.constant 0 : i32
    %c0_i32_0 = arith.constant 0 : i32
    %c0_i32_1 = arith.constant 0 : i32
    return %c0_i32, %c0_i32_0 : i32, i32
  }
  func.func @transform_3(%arg0: i32) -> (i32, i32) {
    %c0_i32 = arith.constant 0 : i32
    %c0_i32_0 = arith.constant 0 : i32
    return %arg0, %c0_i32 : i32, i32
  }
}

</mosaic_0001>

<bundles_post_ra>
// kernel: patch_embed_forward.1
= control target key start
LH: loop header
LB: loop body
LE: loop exit
PB: predicated region body
PF: predicated region fallthrough
CT: control target
= control target key end

     0   :  { %vm69_vm0 = vcmask 523264   ;;  %s251_s0 = inlined_call_operand.vmem [shape: bf16[32,64], index: 0, kind: input, shape index: {}]   ;;  %s252_s1 = inlined_call_operand.vmem [shape: bf16[64,32], index: 1, kind: input, shape index: {}]   ;;  %s253_s2 = inlined_call_operand.vmem [shape: f32[1,32], index: 2, kind: input, shape index: {}]   ;;  %s254_s3 = inlined_call_operand.hbm [shape: f32[32,32], index: 3, kind: output, shape index: {}]  }
   0x1   :  { %v176_v0 = vld [vmem:[%s252_s1 + $0x18] sm:$0xff]   ;;  %v177_v1 = vld [vmem:[%s252_s1 + $0x10] sm:$0xff]   ;;  %v178_v2 = vld [vmem:[%s252_s1 + $0x8] sm:$0xff]  }
   0x2   :  { %161 = vmatprep.subr.bf16.mxu0 %v176_v0  ;;  %v180_v3 = vld [vmem:[%s251_s0] sm:$0xff]  }
   0x3   :  { %162 = vmatpush3.bf16.msra.mxu0 %v176_v0  ;;  %169 = vmatprep.mubr.msk.bf16.mxu0 %vm69_vm0, %v180_v3 }
   0x4   :  { %163 = vmatprep.subr.bf16.mxu0 %v177_v1 }
   0x5   :  { %8 = vsyncpa [#allocation3], 0  ;;  %v179_v4 = vld [vmem:[%s252_s1] sm:$0xff]   ;;  %v181_v5 = vld [vmem:[%s251_s0 + $0x8] sm:$0xff]   ;;  %vm125_vm1 = vcmask 261120   ;;  %s204_s26 = smov [#allocation2]  }
   0x6   :  { %v146_v6 = vld [vmem:[%s253_s2] ss:$0 sm:$0xff]  ;;  %s135_s1 = sshll.u32 %s204_s26, 4  ;;  %s136_s1 = int_to_ptr.vmem [resolvable:$true] %s135_s1 }
   0x7   :  { %164 = vmatpush3.bf16.msra.mxu0 %v177_v1  ;;  %s182_s0 = scalar_lea.vmem %s136_s1, 512  ;;  %p187_p1 = scmp.lt.s32.totalorder %s136_s1, %s136_s1 }
   0x8   :  { %165 = vmatprep.subr.bf16.mxu0 %v178_v2  ;;  %p183_p0 = scmp.ne.s32.totalorder %s136_s1, %s182_s0  ;;  %p188_p2 = scmp.lt.s32.totalorder %s182_s0, %s182_s0 }
   0xa   :  { %p189_p3 = por %p188_p2, %p187_p1 }
   0xb   :  { %166 = vmatpush3.bf16.msra.mxu0 %v178_v2 }
   0xc   :  { %167 = vmatprep.subr.bf16.mxu0 %v179_v4  ;;  %p190_p4 = pnand %p189_p3, %p183_p0 }
   0xf   :  { %168 = vmatpush3.bf16.msra.mxu0 %v179_v4 }
  0x12   :  { %170 = vmatmul.mubr.msk.bf16.vlgmr.msra.gmra.mxu0 %vm69_vm0, %v181_v5 }
  0xd2   :  { %v171_v7 = vpop.f32.mrf.mxu0 }
  0xd3   :  { %v119_v8 = vadd.f32 %v171_v7, %v146_v6 }
  0xd4   :  { %v110_v9 = vpop.f32.mrf.mxu0 }
  0xd5   :  { %128 = vst.msk [vmem:[#allocation2 + $0x10] sm:$0xff] %vm125_vm1, %v119_v8  ;;  %v111_v10 = vadd.f32 %v146_v6, %v110_v9 }
  0xd6   :  { %v172_v11 = vpop.f32.mrf.mxu0 }
  0xd7   :  { %126 = vst.msk [vmem:[#allocation2] sm:$0xff] %vm125_vm1, %v111_v10  ;;  %v122_v12 = vadd.f32 %v172_v11, %v146_v6 }
  0xd8   :  { %v113_v13 = vpop.f32.mrf.mxu0 }
  0xd9   :  { %129 = vst.msk [vmem:[#allocation2 + $0x18] sm:$0xff] %vm125_vm1, %v122_v12  ;;  %v114_v14 = vadd.f32 %v146_v6, %v113_v13 }
  0xdb   :  { %127 = vst.msk [vmem:[#allocation2 + $0x8] sm:$0xff] %vm125_vm1, %v114_v14 }
  0xdc   :  { %193 = shalt.err (!%p190_p4)
}
  0xdd   :  { %s205_s2 = smov 128   ;;  %s206_s27 = smov 8  }
  0xde   :  { %141 = dma.vmem_to_hbm [thread:$0]  %s136_s1, 512, %s254_s3, [#allocation3], %s205_s2, %s205_s2, %s206_s27  }
  0xdf   :  { %202 = dma.done.wait [#allocation3], 512  }
  0xe0   :  { %203 = vsyncadd [#allocation3], 4294966784 }
  0xe1   :  { %145 = vsyncpa [#allocation3], 1 }

</bundles_post_ra>
